<compile_context>
chip_gen: v7x
topology: tpu7x:2x2x1
jax: 0.10.0
libtpu: 0.0.40
codegen_flags: <defaults>
</compile_context>

<pallas_src>
import functools
import math

import jax
import jax.numpy as jnp
from jax.experimental import pallas as pl
from jax.experimental.pallas import tpu as pltpu


LANES = 128
MAX_ROW_TILE = 2048   # (2048, 128) f32 block = 1 MiB per input per buffer
MAX_PARTS = 2         # v7x: 2 TensorCores; v5e/v6e simply iterate this axis


def _dice_bce_kernel(x_ref, t_ref, o_ref, *, rows, row_tile, bpp, needs_mask):
    """Accumulate per-lane partial sums of (x*t, x, t, bce) into o_ref."""
    c = pl.program_id(0)   # part / core index            ("parallel")
    i = pl.program_id(1)   # row-block index within part  ("arbitrary")

    @pl.when(i == 0)
    def _():
        o_ref[...] = jnp.zeros_like(o_ref)

    x = x_ref[...].astype(jnp.float32)
    t = t_ref[...].astype(jnp.float32)

    if needs_mask:
        # Row-level tail mask: rows beyond the real array (over-covered tail
        # block, or a fully out-of-range block whose index was clamped in the
        # index_map) must contribute exactly zero to all four sums.  Masking
        # before the log also keeps garbage tail bytes from propagating NaNs.
        row_start = (c * bpp + i) * row_tile
        rid = jax.lax.broadcasted_iota(jnp.int32, (row_tile, LANES), 0) + row_start
        valid = rid < rows
        x = jnp.where(valid, x, 0.0)
        t = jnp.where(valid, t, 0.0)

    # PyTorch BCELoss clamps the log terms at -100, so 0 * (-100) = 0 for
    # saturated probabilities (and for zero-padded / zero-masked elements).
    log_x = jnp.maximum(jnp.log(x), -100.0)
    log_1mx = jnp.maximum(jnp.log(1.0 - x), -100.0)
    # Folded form of -(t*log_x + (1-t)*log_1mx): saves a mul + sub per vreg.
    bce = -(t * (log_x - log_1mx) + log_1mx)

    # Reduce over rows only; keep per-lane partials resident in the output
    # block.  The single cross-lane reduce happens once, outside the kernel.
    part = jnp.concatenate(
        (jnp.sum(x * t, axis=0, keepdims=True),
         jnp.sum(x, axis=0, keepdims=True),
         jnp.sum(t, axis=0, keepdims=True),
         jnp.sum(bce, axis=0, keepdims=True)),
        axis=0)                                    # (4, LANES)
    o_ref[0] += part


def dice_loss(inputs, targets, *, max_row_tile=MAX_ROW_TILE):
    """Pallas equivalent of DiceLoss.forward(inputs, targets) -> scalar f32."""
    assert inputs.shape == targets.shape
    n_elems = math.prod(inputs.shape)

    x = jnp.ravel(inputs)
    t = jnp.ravel(targets)
    # Keep native dtypes (bf16/f32/int stream as-is); only widen bools, since
    # i1 refs are awkward to stream.
    if x.dtype == jnp.bool_:
        x = x.astype(jnp.float32)
    if t.dtype == jnp.bool_:
        t = t.astype(jnp.float32)

    # Only pad to a multiple of the 128-lane width (usually a no-op for
    # conv-net shapes); tile-granularity padding is replaced by the in-kernel
    # row mask.  Zero padding contributes 0 to all four sums (log clamp).
    pad = (-n_elems) % LANES
    if pad:
        x = jnp.pad(x, (0, pad))
        t = jnp.pad(t, (0, pad))
    rows = (n_elems + pad) // LANES

    x2 = x.reshape(rows, LANES)
    t2 = t.reshape(rows, LANES)

    if rows <= max_row_tile:
        row_tile = rows                       # single full-extent block (legal)
    else:
        row_tile = max(8, (max_row_tile // 8) * 8)   # keep sublane dim 8-aligned

    total_blocks = -(-rows // row_tile)
    num_parts = MAX_PARTS if total_blocks >= MAX_PARTS else 1
    bpp = -(-total_blocks // num_parts)              # row-blocks per part
    grid = (num_parts, bpp)

    # Mask is only needed when the grid over-covers the rows (partial tail
    # block or clamped duplicate block on the last part).
    needs_mask = (total_blocks * row_tile != rows) or (bpp * num_parts != total_blocks)

    def in_index(c, i):
        # Clamp so a part's overhanging step never indexes past the array;
        # its contribution is zeroed by the in-kernel row mask.
        return (jnp.minimum(c * bpp + i, total_blocks - 1), 0)

    kernel = functools.partial(
        _dice_bce_kernel, rows=rows, row_tile=row_tile, bpp=bpp,
        needs_mask=needs_mask)

    partials = pl.pallas_call(
        kernel,
        out_shape=jax.ShapeDtypeStruct((num_parts, 4, LANES), jnp.float32),
        grid_spec=pltpu.PrefetchScalarGridSpec(
            num_scalar_prefetch=0,
            grid=grid,
            in_specs=[
                pl.BlockSpec((row_tile, LANES), in_index),
                pl.BlockSpec((row_tile, LANES), in_index),
            ],
            out_specs=pl.BlockSpec((1, 4, LANES), lambda c, i: (c, 0, 0)),
        ),
        compiler_params=pltpu.CompilerParams(
            dimension_semantics=("parallel", "arbitrary"),
            vmem_limit_bytes=32 * 1024 * 1024,
        ),
    )(x2, t2)

    sums = jnp.sum(partials, axis=(0, 2))                         # (4,)
    intersection, sum_x, sum_t, bce_sum = sums[0], sums[1], sums[2], sums[3]
    dice = (2.0 * intersection + 1.0) / (sum_x + sum_t + 1.0)
    bce = bce_sum / jnp.float32(n_elems)
    return bce + dice


def _reference(inputs, targets):
    x = jnp.ravel(inputs).astype(jnp.float32)
    t = jnp.ravel(targets).astype(jnp.float32)
    intersection = jnp.sum(x * t)
    dice = (2.0 * intersection + 1.0) / (jnp.sum(x) + jnp.sum(t) + 1.0)
    log_x = jnp.maximum(jnp.log(x), -100.0)
    log_1mx = jnp.maximum(jnp.log(1.0 - x), -100.0)
    bce = jnp.mean(-(t * log_x + (1.0 - t) * log_1mx))
    return bce + dice


if __name__ == "__main__":
    key = jax.random.PRNGKey(0)

    def make(shape, k):
        k1, k2 = jax.random.split(k)
        x = jax.random.uniform(k1, shape, dtype=jnp.float32,
                               minval=1e-4, maxval=1.0 - 1e-4)
        t = (jax.random.uniform(k2, shape) > 0.5).astype(jnp.float32)
        return x, t

    k0, k1 = jax.random.split(key)

    # 1) Module-like NCHW input (batch=2, channels=4, spatial=16), default
    #    tiling: single full-extent block, one part, no masking path.
    x, t = make((2, 4, 16, 16), k0)
    loss = jax.block_until_ready(dice_loss(x, t))
    ref = jax.block_until_ready(_reference(x, t))
    if not jnp.allclose(loss, ref, rtol=1e-5, atol=1e-5):
        raise AssertionError(f"mismatch (test 1): pallas={loss} ref={ref}")

    # 2) 3070 elems (not a multiple of 128) with a tiny tile: exercises the
    #    lane pad, the 2-part split, the clamped index_map and the in-kernel
    #    row mask (24 rows -> 3 blocks of 8, 2 parts of 2 blocks each).
    x, t = make((5, 614), k1)
    loss = jax.block_until_ready(dice_loss(x, t, max_row_tile=8))
    ref = jax.block_until_ready(_reference(x, t))
    if not jnp.allclose(loss, ref, rtol=1e-5, atol=1e-5):
        raise AssertionError(f"mismatch (test 2): pallas={loss} ref={ref}")

    print("KERNEL_OK")
</pallas_src>

<mosaic_0001>
module attributes {stable_mosaic.version = 11 : i64} {
  func.func @_dice_bce_kernel(%arg0: i32, %arg1: i32, %arg2: memref<16x128xf32, #tpu.memory_space<vmem>>, %arg3: memref<16x128xf32, #tpu.memory_space<vmem>>, %arg4: memref<1x4x128xf32, #tpu.memory_space<vmem>>) attributes {dimension_semantics = [#tpu.dimension_semantics<parallel>, #tpu.dimension_semantics<arbitrary>], iteration_bounds = array<i64: 1, 1>, scalar_prefetch = 0 : i64, scratch_operands = 0 : i64, tpu.core_type = #tpu.core_type<tc>, window_params = [{transform_indices = @transform_0, window_bounds = array<i64: 16, 128>}, {transform_indices = @transform_1, window_bounds = array<i64: 16, 128>}, {transform_indices = @transform_2, window_bounds = array<i64: 1, 4, 128>}]} {
    %c0_i32 = arith.constant 0 : i32
    %0 = arith.cmpi eq, %arg1, %c0_i32 : i32
    %1 = arith.extui %0 : i1 to i32
    %c0_i32_0 = arith.constant 0 : i32
    %2 = arith.cmpi ne, %1, %c0_i32_0 : i32
    scf.if %2 {
      %cst_17 = arith.constant 0.000000e+00 : f32
      %34 = vector.broadcast %cst_17 : f32 to vector<1x4x128xf32>
      %c0_18 = arith.constant 0 : index
      %c0_19 = arith.constant 0 : index
      %c0_20 = arith.constant 0 : index
      %35 = vector.load %arg4[%c0_18, %c0_19, %c0_20] : memref<1x4x128xf32, #tpu.memory_space<vmem>>, vector<1x4x128xf32>
      tpu.vector_store %arg4[%c0_18, %c0_19, %c0_20], %34 {strides = array<i32>} : memref<1x4x128xf32, #tpu.memory_space<vmem>>, vector<1x4x128xf32>,
    } else {
    }
    %c0 = arith.constant 0 : index
    %c0_1 = arith.constant 0 : index
    %3 = vector.load %arg2[%c0, %c0_1] : memref<16x128xf32, #tpu.memory_space<vmem>>, vector<16x128xf32>
    %c0_2 = arith.constant 0 : index
    %c0_3 = arith.constant 0 : index
    %4 = vector.load %arg3[%c0_2, %c0_3] : memref<16x128xf32, #tpu.memory_space<vmem>>, vector<16x128xf32>
    %5 = math.log %3 : vector<16x128xf32>
    %cst = arith.constant -1.000000e+02 : f32
    %6 = vector.broadcast %cst : f32 to vector<16x128xf32>
    %7 = arith.maximumf %5, %6 : vector<16x128xf32>
    %cst_4 = arith.constant 1.000000e+00 : f32
    %8 = vector.broadcast %cst_4 : f32 to vector<16x128xf32>
    %9 = arith.subf %8, %3 : vector<16x128xf32>
    %10 = math.log %9 : vector<16x128xf32>
    %cst_5 = arith.constant -1.000000e+02 : f32
    %11 = vector.broadcast %cst_5 : f32 to vector<16x128xf32>
    %12 = arith.maximumf %10, %11 : vector<16x128xf32>
    %13 = arith.subf %7, %12 : vector<16x128xf32>
    %14 = arith.mulf %4, %13 : vector<16x128xf32>
    %15 = arith.addf %14, %12 : vector<16x128xf32>
    %cst_6 = arith.constant 0.000000e+00 : f32
    %16 = vector.broadcast %cst_6 : f32 to vector<16x128xf32>
    %17 = arith.subf %16, %15 : vector<16x128xf32>
    %18 = arith.mulf %3, %4 : vector<16x128xf32>
    %cst_7 = arith.constant dense<0.000000e+00> : vector<128xf32>
    %19 = vector.multi_reduction <add>, %18, %cst_7 [0] : vector<16x128xf32> to vector<128xf32>
    %20 = vector.shape_cast %19 : vector<128xf32> to vector<1x128xf32>
    %cst_8 = arith.constant dense<0.000000e+00> : vector<128xf32>
    %21 = vector.multi_reduction <add>, %3, %cst_8 [0] : vector<16x128xf32> to vector<128xf32>
    %22 = vector.shape_cast %21 : vector<128xf32> to vector<1x128xf32>
    %cst_9 = arith.constant dense<0.000000e+00> : vector<128xf32>
    %23 = vector.multi_reduction <add>, %4, %cst_9 [0] : vector<16x128xf32> to vector<128xf32>
    %24 = vector.shape_cast %23 : vector<128xf32> to vector<1x128xf32>
    %cst_10 = arith.constant dense<0.000000e+00> : vector<128xf32>
    %25 = vector.multi_reduction <add>, %17, %cst_10 [0] : vector<16x128xf32> to vector<128xf32>
    %26 = vector.shape_cast %25 : vector<128xf32> to vector<1x128xf32>
    %27 = tpu.concatenate %20, %22, %24, %26 in 0 : vector<1x128xf32>, vector<1x128xf32>, vector<1x128xf32>, vector<1x128xf32> -> vector<4x128xf32>
    %c0_11 = arith.constant 0 : index
    %c0_12 = arith.constant 0 : index
    %c0_13 = arith.constant 0 : index
    %28 = vector.load %arg4[%c0_11, %c0_12, %c0_13] : memref<1x4x128xf32, #tpu.memory_space<vmem>>, vector<1x4x128xf32>
    %29 = vector.shape_cast %28 : vector<1x4x128xf32> to vector<4x128xf32>
    %30 = arith.addf %29, %27 : vector<4x128xf32>
    %c0_14 = arith.constant 0 : index
    %c0_15 = arith.constant 0 : index
    %c0_16 = arith.constant 0 : index
    %31 = vector.load %arg4[%c0_14, %c0_15, %c0_16] : memref<1x4x128xf32, #tpu.memory_space<vmem>>, vector<1x4x128xf32>
    %32 = vector.shape_cast %31 : vector<1x4x128xf32> to vector<4x128xf32>
    %33 = vector.shape_cast %30 : vector<4x128xf32> to vector<1x4x128xf32>
    tpu.vector_store %arg4[%c0_14, %c0_15, %c0_16], %33 {strides = array<i32>} : memref<1x4x128xf32, #tpu.memory_space<vmem>>, vector<1x4x128xf32>,
    return
  }
  func.func @transform_0(%arg0: i32, %arg1: i32) -> (i32, i32) {
    %c1_i32 = arith.constant 1 : i32
    %0 = arith.muli %arg0, %c1_i32 : i32
    %1 = arith.addi %0, %arg1 : i32
    %c0_i32 = arith.constant 0 : i32
    %2 = arith.minsi %1, %c0_i32 : i32
    %c0_i32_0 = arith.constant 0 : i32
    %c0_i32_1 = arith.constant 0 : i32
    return %2, %c0_i32_0 : i32, i32
  }
  func.func @transform_1(%arg0: i32, %arg1: i32) -> (i32, i32) {
    %c1_i32 = arith.constant 1 : i32
    %0 = arith.muli %arg0, %c1_i32 : i32
    %1 = arith.addi %0, %arg1 : i32
    %c0_i32 = arith.constant 0 : i32
    %2 = arith.minsi %1, %c0_i32 : i32
    %c0_i32_0 = arith.constant 0 : i32
    %c0_i32_1 = arith.constant 0 : i32
    return %2, %c0_i32_0 : i32, i32
  }
  func.func @transform_2(%arg0: i32, %arg1: i32) -> (i32, i32, i32) {
    %c0_i32 = arith.constant 0 : i32
    %c0_i32_0 = arith.constant 0 : i32
    %c0_i32_1 = arith.constant 0 : i32
    return %arg0, %c0_i32, %c0_i32_0 : i32, i32, i32
  }
}

</mosaic_0001>

<bundles_post_ra>
// kernel: tpu_custom_call.1
= control target key start
LH: loop header
LB: loop body
LE: loop exit
PB: predicated region body
PF: predicated region fallthrough
CT: control target
= control target key end

     0   :  { %7 = vsyncpa [#allocation3], 0  ;;  %s293_s0 = inlined_call_operand.hbm [shape: f32[16,128], index: 0, kind: input, shape index: {}]   ;;  %s294_s1 = inlined_call_operand.hbm [shape: f32[16,128], index: 1, kind: input, shape index: {}]   ;;  %s295_s2 = inlined_call_operand.hbm [shape: f32[1,4,128], index: 2, kind: output, shape index: {}]  }
   0x1   :  { %8 = vsyncpa [#allocation6], 0 }
   0x2   :  { %9 = vsyncpa [#allocation4], 0  ;;  %s236_s9 = smov [#allocation2]   ;;  %s164_s13 = scalar_lea.hbm %s293_s0, 256 }
   0x3   :  { %s21_s10 = sshll.u32 %s236_s9, 4  ;;  %p165_p0 = scmp.ne.s32.totalorder %s293_s0, %s164_s13  ;;  %s22_s10 = int_to_ptr.vmem [resolvable:$true] %s21_s10 }
   0x4   :  { %p168_p1 = scmp.lt.u32.totalorder %s164_s13, %s293_s0 }
   0x6   :  { %p170_p2 = pnand %p168_p1, %p165_p0 }
   0x8   :  { %173 = shalt.err (!%p170_p2)
}
   0x9   :  { %s174_s18 = scalar_lea.vmem %s22_s10, 256  ;;  %p179_p4 = scmp.lt.s32.totalorder %s22_s10, %s22_s10 }
   0xa   :  { %p175_p3 = scmp.ne.s32.totalorder %s22_s10, %s174_s18  ;;  %p180_p5 = scmp.lt.s32.totalorder %s174_s18, %s174_s18 }
   0xc   :  { %p181_p6 = por %p180_p5, %p179_p4 }
   0xe   :  { %p182_p7 = pnand %p181_p6, %p175_p3 }
  0x10   :  { %185 = shalt.err (!%p182_p7)
}
  0x11   :  { %s237_s19 = smov 128   ;;  %s238_s20 = smov 8  }
  0x12   :  { %27 = dma.hbm_to_vmem [thread:$0]  %s293_s0, 256, %s22_s10, [#allocation3], %s237_s19, %s237_s19, %s238_s20  }
  0x13   :  { %s239_s23 = smov [#allocation5]   ;;  %s186_s27 = scalar_lea.hbm %s294_s1, 256 }
  0x14   :  { %s39_s24 = sshll.u32 %s239_s23, 4  ;;  %p187_p8 = scmp.ne.s32.totalorder %s294_s1, %s186_s27  ;;  %s40_s24 = int_to_ptr.vmem [resolvable:$true] %s39_s24 }
  0x15   :  { %p190_p9 = scmp.lt.u32.totalorder %s186_s27, %s294_s1 }
  0x17   :  { %p192_p10 = pnand %p190_p9, %p187_p8 }
  0x19   :  { %195 = shalt.err (!%p192_p10)
}
  0x1a   :  { %s196_s4 = scalar_lea.vmem %s40_s24, 256  ;;  %p201_p12 = scmp.lt.s32.totalorder %s40_s24, %s40_s24 }
  0x1b   :  { %p197_p11 = scmp.ne.s32.totalorder %s40_s24, %s196_s4  ;;  %p202_p13 = scmp.lt.s32.totalorder %s196_s4, %s196_s4 }
  0x1d   :  { %p203_p0 = por %p202_p13, %p201_p12 }
  0x1f   :  { %p204_p1 = pnand %p203_p0, %p197_p11 }
  0x21   :  { %207 = shalt.err (!%p204_p1)
}
  0x22   :  { %45 = dma.hbm_to_vmem [thread:$0]  %s294_s1, 256, %s40_s24, [#allocation6], %s237_s19, %s237_s19, %s238_s20  }
  0x23   :  { %230 = dma.done.wait [#allocation3], 256  }
  0x24   :  { %231 = vsyncadd [#allocation3], 4294967040 }
  0x25   :  { %232 = dma.done.wait [#allocation6], 256  }
  0x26   :  { %233 = vsyncadd [#allocation6], 4294967040  ;;  %v240_v0 = vmov 0.0   ;;  %v65_v1 = vld [vmem:[#allocation2] sm:$0xff]  ;;  %v66_v2 = vld [vmem:[#allocation2 + $0x8] sm:$0xff]  ;;  %vm121_vm0 = vcmask 1040384  }
  0x27   :  { %64 = vst [vmem:[#allocation7] sm:$0xf] %v240_v0  ;;  %156 = vlog2.f32 %v65_v1  ;;  %v75_v3 = vsub.f32 1.0, %v65_v1  ;;  %v76_v4 = vsub.f32 1.0, %v66_v2  ;;  %v67_v5 = vld [vmem:[#allocation5] sm:$0xff]  ;;  %v68_v6 = vld [vmem:[#allocation5 + $0x8] sm:$0xff]  ;;  %v100_v10 = vadd.f32 %v66_v2, %v65_v1 }
  0x28   :  { %158 = vlog2.f32 %v66_v2  ;;  %v91_v7 = vmul.f32 %v67_v5, %v65_v1  ;;  %v92_v8 = vmul.f32 %v68_v6, %v66_v2  ;;  %v107_v11 = vadd.f32 %v68_v6, %v67_v5  ;;  %s241_s1 = smov [#allocation7]  }
  0x29   :  { %160 = vlog2.f32 %v75_v3  ;;  %v101_v14 = vrot.slane %v100_v10, 4  ;;  %vm123_vm1 = vcmask 1041408   ;;  %vm125_vm2 = vcmask 1042432   ;;  %s136_s6 = sshll.u32 %s241_s1, 4  ;;  %s137_s6 = int_to_ptr.vmem [resolvable:$true] %s136_s6 }
  0x2a   :  { %162 = vlog2.f32 %v76_v4  ;;  %v93_v9 = vadd.f32 %v92_v8, %v91_v7  ;;  %v108_v22 = vrot.slane %v107_v11, 4  ;;  %s208_s7 = scalar_lea.vmem %s137_s6, 64  ;;  %p213_p3 = scmp.lt.s32.totalorder %s137_s6, %s137_s6 }
  0x2b   :  { %v102_v26 = vadd.f32 %v101_v14, %v100_v10  ;;  %p209_p2 = scmp.ne.s32.totalorder %s137_s6, %s208_s7  ;;  %p214_p4 = scmp.lt.s32.totalorder %s208_s7, %s208_s7 }
  0x2c   :  { %v94_v13 = vrot.slane %v93_v9, 4  ;;  %v109_v30 = vadd.f32 %v108_v22, %v107_v11 }
  0x2d   :  { %v103_v33 = vrot.slane %v102_v26, 2  ;;  %p215_p5 = por %p214_p4, %p213_p3 }
  0x2e   :  { %v95_v25 = vadd.f32 %v94_v13, %v93_v9  ;;  %v110_v37 = vrot.slane %v109_v30, 2  ;;  %v127_v59 = vld [vmem:[#allocation7] sm:$0xf] }
  0x2f   :  { %v104_v40 = vadd.f32 %v103_v33, %v102_v26  ;;  %p216_p6 = pnand %p215_p5, %p209_p2 }
  0x30   :  { %v96_v32 = vrot.slane %v95_v25, 2  ;;  %v111_v43 = vadd.f32 %v110_v37, %v109_v30 }
  0x31   :  { %v157_v12 = vpop.eup %156  ;;  %v105_v45 = vrot.slane %v104_v40, 1 }
  0x32   :  { %v159_v15 = vpop.eup %158  ;;  %v70_v16 = vmul.f32 0.6931472, %v157_v12  ;;  %v97_v39 = vadd.f32 %v96_v32, %v95_v25  ;;  %v112_v48 = vrot.slane %v111_v43, 1 }
  0x33   :  { %v161_v17 = vpop.eup %160  ;;  %v72_v18 = vmul.f32 0.6931472, %v159_v15  ;;  %v106_v50 = vadd.f32 %v105_v45, %v104_v40 }
  0x34   :  { %v163_v19 = vpop.eup %162  ;;  %v73_v20 = vmax.f32 %v70_v16, -100.0  ;;  %v78_v21 = vmul.f32 0.6931472, %v161_v17  ;;  %v98_v44 = vrot.slane %v97_v39, 1  ;;  %v113_v53 = vadd.f32 %v112_v48, %v111_v43 }
  0x35   :  { %v74_v23 = vmax.f32 %v72_v18, -100.0  ;;  %v80_v24 = vmul.f32 0.6931472, %v163_v19 }
  0x36   :  { %v81_v27 = vmax.f32 %v78_v21, -100.0  ;;  %v99_v49 = vadd.f32 %v98_v44, %v97_v39 }
  0x37   :  { %v82_v28 = vmax.f32 %v80_v24, -100.0 }
  0x38   :  { %v83_v29 = vsub.f32 %v73_v20, %v81_v27  ;;  %v122_v55 = vsel %vm121_vm0, %v99_v49, %v106_v50 }
  0x39   :  { %v84_v31 = vsub.f32 %v74_v23, %v82_v28  ;;  %v124_v57 = vsel %vm123_vm1, %v122_v55, %v113_v53 }
  0x3a   :  { %v85_v34 = vmul.f32 %v83_v29, %v67_v5 }
  0x3b   :  { %v86_v35 = vmul.f32 %v84_v31, %v68_v6 }
  0x3c   :  { %v87_v36 = vadd.f32 %v85_v34, %v81_v27 }
  0x3d   :  { %v88_v38 = vadd.f32 %v86_v35, %v82_v28 }
  0x3e   :  { %v89_v41 = vsub.f32 0.0, %v87_v36 }
  0x3f   :  { %v90_v42 = vsub.f32 0.0, %v88_v38 }
  0x41   :  { %v114_v46 = vadd.f32 %v90_v42, %v89_v41 }
  0x43   :  { %v115_v47 = vrot.slane %v114_v46, 4 }
  0x45   :  { %v116_v51 = vadd.f32 %v115_v47, %v114_v46 }
  0x47   :  { %v117_v52 = vrot.slane %v116_v51, 2 }
  0x49   :  { %v118_v54 = vadd.f32 %v117_v52, %v116_v51 }
  0x4b   :  { %v119_v56 = vrot.slane %v118_v54, 1 }
  0x4d   :  { %v120_v58 = vadd.f32 %v119_v56, %v118_v54 }
  0x4f   :  { %v126_v60 = vsel %vm125_vm2, %v124_v57, %v120_v58 }
  0x50   :  { %v128_v61 = vadd.f32 %v127_v59, %v126_v60 }
  0x52   :  { %129 = vst [vmem:[#allocation7] sm:$0xf] %v128_v61 }
  0x53   :  { %219 = shalt.err (!%p216_p6)
}
  0x54   :  { %s220_s10 = scalar_lea.hbm %s295_s2, 64 }
  0x55   :  { %p221_p7 = scmp.ne.s32.totalorder %s295_s2, %s220_s10  ;;  %p224_p8 = scmp.lt.u32.totalorder %s220_s10, %s295_s2 }
  0x57   :  { %p226_p9 = pnand %p224_p8, %p221_p7 }
  0x59   :  { %229 = shalt.err (!%p226_p9)
}
  0x5a   :  { %139 = dma.vmem_to_hbm [thread:$0]  %s137_s6, 64, %s295_s2, [#allocation4]  }
  0x5b   :  { %234 = dma.done.wait [#allocation4], 64  }
  0x5c   :  { %235 = vsyncadd [#allocation4], 4294967232 }
  0x5d   :  { %143 = vsyncpa [#allocation3], 1 }
  0x5e   :  { %144 = vsyncpa [#allocation6], 1 }
  0x5f   :  { %145 = vsyncpa [#allocation4], 1 }

</bundles_post_ra>
